<compile_context>
chip_gen: v6e
topology: v6e:2x2x1
jax: 0.10.0
libtpu: 0.0.40
codegen_flags: <defaults>
</compile_context>

<pallas_src>
import functools

import jax
import jax.numpy as jnp
from jax.experimental import pallas as pl
from jax.experimental.pallas import tpu as pltpu


def _round_up(x: int, m: int) -> int:
    return (x + m - 1) // m * m


def _embed_kernel(ids_smem, emb_ref, out_ref, *, tile_tokens: int):
    """Gather `tile_tokens` rows of the VMEM-resident table into the output tile.

    ids_smem: (N_pad,) int32 in SMEM (scalar prefetch).
    emb_ref : (V, D) embedding table, resident in VMEM across all grid steps.
    out_ref : (T, D) output tile for this grid step.
    """
    base = pl.program_id(0) * tile_tokens
    # Fully unrolled at trace time (T is static); each step is a dynamic-row
    # VMEM load + a static-row store into the output tile.  The HBM writeback
    # of the whole (T, D) tile is a single dense DMA handled by the pipeline.
    for t in range(tile_tokens):
        rid = ids_smem[base + t]
        out_ref[pl.ds(t, 1), :] = emb_ref[pl.ds(rid, 1), :]


def pretrained_embedding(ids, emb_weight, *, tile_tokens: int = 256):
    """out[b, s, :] = emb_weight[ids[b, s], :]  (frozen-embedding forward)."""
    B, S = ids.shape
    V, D = emb_weight.shape

    flat_ids = ids.reshape(-1).astype(jnp.int32)
    N = flat_ids.shape[0]
    # Guard against out-of-range ids (the DMA bounds check is the only other net).
    flat_ids = jnp.clip(flat_ids, 0, V - 1)

    # Sublane-aligned token tile; pad the token axis up to a tile multiple.
    T = min(tile_tokens, _round_up(N, 8))
    N_pad = _round_up(N, T)
    if N_pad != N:
        flat_ids = jnp.pad(flat_ids, (0, N_pad - N))  # pad with id 0 (padding row)

    grid = (N_pad // T,)

    out_flat = pl.pallas_call(
        functools.partial(_embed_kernel, tile_tokens=T),
        out_shape=jax.ShapeDtypeStruct((N_pad, D), emb_weight.dtype),
        grid_spec=pltpu.PrefetchScalarGridSpec(
            num_scalar_prefetch=1,          # flat_ids land in SMEM
            grid=grid,
            in_specs=[
                # Whole table, constant index_map -> DMA'd once, stays in VMEM.
                pl.BlockSpec((V, D), lambda i, ids_sm: (0, 0)),
            ],
            out_specs=pl.BlockSpec((T, D), lambda i, ids_sm: (i, 0)),
        ),
        compiler_params=pltpu.CompilerParams(
            # Disjoint output tiles per step -> safe to shard across TCs (v7x).
            dimension_semantics=("parallel",),
            # Explicit budget: safe on v5e/v6e (128 MiB phys) and v7x (64 MiB).
            vmem_limit_bytes=32 * 1024 * 1024,
        ),
    )(flat_ids, emb_weight)

    return out_flat[:N].reshape(B, S, D)


if __name__ == "__main__":
    # Small, module-consistent shapes.
    vocab_size = 64
    emb_dim = 128
    B, S = 2, 8

    key = jax.random.PRNGKey(0)
    k_w, k_x = jax.random.split(key)

    # Deterministic "pretrained" weight (synthetic, not loaded from disk).
    init_weight = jax.random.normal(k_w, (vocab_size, emb_dim), dtype=jnp.float32)
    # Conventional padding row = 0 (kept inside init_weight, matching torch copy_).
    init_weight = init_weight.at[0].set(0.0)

    x = jax.random.randint(k_x, (B, S), 0, vocab_size, dtype=jnp.int32)

    out = pretrained_embedding(x, init_weight)
    out = jax.block_until_ready(out)

    # Sanity check against plain JAX gather.
    ref = jnp.take(init_weight, x, axis=0)
    assert out.shape == (B, S, emb_dim)
    assert jnp.allclose(out, ref), "embedding gather mismatch"

    print("KERNEL_OK")
</pallas_src>

<mosaic_0001>
module attributes {stable_mosaic.version = 11 : i64} {
  func.func @_embed_kernel(%arg0: i32, %arg1: memref<16xi32, #tpu.memory_space<smem>>, %arg2: memref<64x128xf32, #tpu.memory_space<vmem>>, %arg3: memref<16x128xf32, #tpu.memory_space<vmem>>) attributes {dimension_semantics = [#tpu.dimension_semantics<parallel>], iteration_bounds = array<i64: 1>, scalar_prefetch = 1 : i64, scratch_operands = 0 : i64, tpu.core_type = #tpu.core_type<tc>, window_params = [{pipeline_mode = #tpu.pipeline_mode<synchronous>, transform_indices = @transform_0, window_bounds = array<i64: 64, 128>}, {transform_indices = @transform_1, window_bounds = array<i64: 16, 128>}]} {
    %c16_i32 = arith.constant 16 : i32
    %0 = arith.muli %arg0, %c16_i32 : i32
    %c0_i32 = arith.constant 0 : i32
    %1 = arith.addi %0, %c0_i32 : i32
    %2 = arith.index_cast %1 : i32 to index
    %3 = memref.load %arg1[%2] : memref<16xi32, #tpu.memory_space<smem>>
    %4 = arith.index_cast %3 : i32 to index
    %c0 = arith.constant 0 : index
    %5 = vector.load %arg2[%4, %c0] : memref<64x128xf32, #tpu.memory_space<vmem>>, vector<1x128xf32>
    %c0_0 = arith.constant 0 : index
    %c0_1 = arith.constant 0 : index
    %6 = vector.load %arg3[%c0_0, %c0_1] : memref<16x128xf32, #tpu.memory_space<vmem>>, vector<1x128xf32>
    tpu.vector_store %arg3[%c0_0, %c0_1], %5 {strides = array<i32>} : memref<16x128xf32, #tpu.memory_space<vmem>>, vector<1x128xf32>,
    %c1_i32 = arith.constant 1 : i32
    %7 = arith.addi %0, %c1_i32 : i32
    %8 = arith.index_cast %7 : i32 to index
    %9 = memref.load %arg1[%8] : memref<16xi32, #tpu.memory_space<smem>>
    %10 = arith.index_cast %9 : i32 to index
    %c0_2 = arith.constant 0 : index
    %11 = vector.load %arg2[%10, %c0_2] : memref<64x128xf32, #tpu.memory_space<vmem>>, vector<1x128xf32>
    %c1 = arith.constant 1 : index
    %c0_3 = arith.constant 0 : index
    %12 = vector.load %arg3[%c1, %c0_3] : memref<16x128xf32, #tpu.memory_space<vmem>>, vector<1x128xf32>
    tpu.vector_store %arg3[%c1, %c0_3], %11 {strides = array<i32>} : memref<16x128xf32, #tpu.memory_space<vmem>>, vector<1x128xf32>,
    %c2_i32 = arith.constant 2 : i32
    %13 = arith.addi %0, %c2_i32 : i32
    %14 = arith.index_cast %13 : i32 to index
    %15 = memref.load %arg1[%14] : memref<16xi32, #tpu.memory_space<smem>>
    %16 = arith.index_cast %15 : i32 to index
    %c0_4 = arith.constant 0 : index
    %17 = vector.load %arg2[%16, %c0_4] : memref<64x128xf32, #tpu.memory_space<vmem>>, vector<1x128xf32>
    %c2 = arith.constant 2 : index
    %c0_5 = arith.constant 0 : index
    %18 = vector.load %arg3[%c2, %c0_5] : memref<16x128xf32, #tpu.memory_space<vmem>>, vector<1x128xf32>
    tpu.vector_store %arg3[%c2, %c0_5], %17 {strides = array<i32>} : memref<16x128xf32, #tpu.memory_space<vmem>>, vector<1x128xf32>,
    %c3_i32 = arith.constant 3 : i32
    %19 = arith.addi %0, %c3_i32 : i32
    %20 = arith.index_cast %19 : i32 to index
    %21 = memref.load %arg1[%20] : memref<16xi32, #tpu.memory_space<smem>>
    %22 = arith.index_cast %21 : i32 to index
    %c0_6 = arith.constant 0 : index
    %23 = vector.load %arg2[%22, %c0_6] : memref<64x128xf32, #tpu.memory_space<vmem>>, vector<1x128xf32>
    %c3 = arith.constant 3 : index
    %c0_7 = arith.constant 0 : index
    %24 = vector.load %arg3[%c3, %c0_7] : memref<16x128xf32, #tpu.memory_space<vmem>>, vector<1x128xf32>
    tpu.vector_store %arg3[%c3, %c0_7], %23 {strides = array<i32>} : memref<16x128xf32, #tpu.memory_space<vmem>>, vector<1x128xf32>,
    %c4_i32 = arith.constant 4 : i32
    %25 = arith.addi %0, %c4_i32 : i32
    %26 = arith.index_cast %25 : i32 to index
    %27 = memref.load %arg1[%26] : memref<16xi32, #tpu.memory_space<smem>>
    %28 = arith.index_cast %27 : i32 to index
    %c0_8 = arith.constant 0 : index
    %29 = vector.load %arg2[%28, %c0_8] : memref<64x128xf32, #tpu.memory_space<vmem>>, vector<1x128xf32>
    %c4 = arith.constant 4 : index
    %c0_9 = arith.constant 0 : index
    %30 = vector.load %arg3[%c4, %c0_9] : memref<16x128xf32, #tpu.memory_space<vmem>>, vector<1x128xf32>
    tpu.vector_store %arg3[%c4, %c0_9], %29 {strides = array<i32>} : memref<16x128xf32, #tpu.memory_space<vmem>>, vector<1x128xf32>,
    %c5_i32 = arith.constant 5 : i32
    %31 = arith.addi %0, %c5_i32 : i32
    %32 = arith.index_cast %31 : i32 to index
    %33 = memref.load %arg1[%32] : memref<16xi32, #tpu.memory_space<smem>>
    %34 = arith.index_cast %33 : i32 to index
    %c0_10 = arith.constant 0 : index
    %35 = vector.load %arg2[%34, %c0_10] : memref<64x128xf32, #tpu.memory_space<vmem>>, vector<1x128xf32>
    %c5 = arith.constant 5 : index
    %c0_11 = arith.constant 0 : index
    %36 = vector.load %arg3[%c5, %c0_11] : memref<16x128xf32, #tpu.memory_space<vmem>>, vector<1x128xf32>
    tpu.vector_store %arg3[%c5, %c0_11], %35 {strides = array<i32>} : memref<16x128xf32, #tpu.memory_space<vmem>>, vector<1x128xf32>,
    %c6_i32 = arith.constant 6 : i32
    %37 = arith.addi %0, %c6_i32 : i32
    %38 = arith.index_cast %37 : i32 to index
    %39 = memref.load %arg1[%38] : memref<16xi32, #tpu.memory_space<smem>>
    %40 = arith.index_cast %39 : i32 to index
    %c0_12 = arith.constant 0 : index
    %41 = vector.load %arg2[%40, %c0_12] : memref<64x128xf32, #tpu.memory_space<vmem>>, vector<1x128xf32>
    %c6 = arith.constant 6 : index
    %c0_13 = arith.constant 0 : index
    %42 = vector.load %arg3[%c6, %c0_13] : memref<16x128xf32, #tpu.memory_space<vmem>>, vector<1x128xf32>
    tpu.vector_store %arg3[%c6, %c0_13], %41 {strides = array<i32>} : memref<16x128xf32, #tpu.memory_space<vmem>>, vector<1x128xf32>,
    %c7_i32 = arith.constant 7 : i32
    %43 = arith.addi %0, %c7_i32 : i32
    %44 = arith.index_cast %43 : i32 to index
    %45 = memref.load %arg1[%44] : memref<16xi32, #tpu.memory_space<smem>>
    %46 = arith.index_cast %45 : i32 to index
    %c0_14 = arith.constant 0 : index
    %47 = vector.load %arg2[%46, %c0_14] : memref<64x128xf32, #tpu.memory_space<vmem>>, vector<1x128xf32>
    %c7 = arith.constant 7 : index
    %c0_15 = arith.constant 0 : index
    %48 = vector.load %arg3[%c7, %c0_15] : memref<16x128xf32, #tpu.memory_space<vmem>>, vector<1x128xf32>
    tpu.vector_store %arg3[%c7, %c0_15], %47 {strides = array<i32>} : memref<16x128xf32, #tpu.memory_space<vmem>>, vector<1x128xf32>,
    %c8_i32 = arith.constant 8 : i32
    %49 = arith.addi %0, %c8_i32 : i32
    %50 = arith.index_cast %49 : i32 to index
    %51 = memref.load %arg1[%50] : memref<16xi32, #tpu.memory_space<smem>>
    %52 = arith.index_cast %51 : i32 to index
    %c0_16 = arith.constant 0 : index
    %53 = vector.load %arg2[%52, %c0_16] : memref<64x128xf32, #tpu.memory_space<vmem>>, vector<1x128xf32>
    %c8 = arith.constant 8 : index
    %c0_17 = arith.constant 0 : index
    %54 = vector.load %arg3[%c8, %c0_17] : memref<16x128xf32, #tpu.memory_space<vmem>>, vector<1x128xf32>
    tpu.vector_store %arg3[%c8, %c0_17], %53 {strides = array<i32>} : memref<16x128xf32, #tpu.memory_space<vmem>>, vector<1x128xf32>,
    %c9_i32 = arith.constant 9 : i32
    %55 = arith.addi %0, %c9_i32 : i32
    %56 = arith.index_cast %55 : i32 to index
    %57 = memref.load %arg1[%56] : memref<16xi32, #tpu.memory_space<smem>>
    %58 = arith.index_cast %57 : i32 to index
    %c0_18 = arith.constant 0 : index
    %59 = vector.load %arg2[%58, %c0_18] : memref<64x128xf32, #tpu.memory_space<vmem>>, vector<1x128xf32>
    %c9 = arith.constant 9 : index
    %c0_19 = arith.constant 0 : index
    %60 = vector.load %arg3[%c9, %c0_19] : memref<16x128xf32, #tpu.memory_space<vmem>>, vector<1x128xf32>
    tpu.vector_store %arg3[%c9, %c0_19], %59 {strides = array<i32>} : memref<16x128xf32, #tpu.memory_space<vmem>>, vector<1x128xf32>,
    %c10_i32 = arith.constant 10 : i32
    %61 = arith.addi %0, %c10_i32 : i32
    %62 = arith.index_cast %61 : i32 to index
    %63 = memref.load %arg1[%62] : memref<16xi32, #tpu.memory_space<smem>>
    %64 = arith.index_cast %63 : i32 to index
    %c0_20 = arith.constant 0 : index
    %65 = vector.load %arg2[%64, %c0_20] : memref<64x128xf32, #tpu.memory_space<vmem>>, vector<1x128xf32>
    %c10 = arith.constant 10 : index
    %c0_21 = arith.constant 0 : index
    %66 = vector.load %arg3[%c10, %c0_21] : memref<16x128xf32, #tpu.memory_space<vmem>>, vector<1x128xf32>
    tpu.vector_store %arg3[%c10, %c0_21], %65 {strides = array<i32>} : memref<16x128xf32, #tpu.memory_space<vmem>>, vector<1x128xf32>,
    %c11_i32 = arith.constant 11 : i32
    %67 = arith.addi %0, %c11_i32 : i32
    %68 = arith.index_cast %67 : i32 to index
    %69 = memref.load %arg1[%68] : memref<16xi32, #tpu.memory_space<smem>>
    %70 = arith.index_cast %69 : i32 to index
    %c0_22 = arith.constant 0 : index
    %71 = vector.load %arg2[%70, %c0_22] : memref<64x128xf32, #tpu.memory_space<vmem>>, vector<1x128xf32>
    %c11 = arith.constant 11 : index
    %c0_23 = arith.constant 0 : index
    %72 = vector.load %arg3[%c11, %c0_23] : memref<16x128xf32, #tpu.memory_space<vmem>>, vector<1x128xf32>
    tpu.vector_store %arg3[%c11, %c0_23], %71 {strides = array<i32>} : memref<16x128xf32, #tpu.memory_space<vmem>>, vector<1x128xf32>,
    %c12_i32 = arith.constant 12 : i32
    %73 = arith.addi %0, %c12_i32 : i32
    %74 = arith.index_cast %73 : i32 to index
    %75 = memref.load %arg1[%74] : memref<16xi32, #tpu.memory_space<smem>>
    %76 = arith.index_cast %75 : i32 to index
    %c0_24 = arith.constant 0 : index
    %77 = vector.load %arg2[%76, %c0_24] : memref<64x128xf32, #tpu.memory_space<vmem>>, vector<1x128xf32>
    %c12 = arith.constant 12 : index
    %c0_25 = arith.constant 0 : index
    %78 = vector.load %arg3[%c12, %c0_25] : memref<16x128xf32, #tpu.memory_space<vmem>>, vector<1x128xf32>
    tpu.vector_store %arg3[%c12, %c0_25], %77 {strides = array<i32>} : memref<16x128xf32, #tpu.memory_space<vmem>>, vector<1x128xf32>,
    %c13_i32 = arith.constant 13 : i32
    %79 = arith.addi %0, %c13_i32 : i32
    %80 = arith.index_cast %79 : i32 to index
    %81 = memref.load %arg1[%80] : memref<16xi32, #tpu.memory_space<smem>>
    %82 = arith.index_cast %81 : i32 to index
    %c0_26 = arith.constant 0 : index
    %83 = vector.load %arg2[%82, %c0_26] : memref<64x128xf32, #tpu.memory_space<vmem>>, vector<1x128xf32>
    %c13 = arith.constant 13 : index
    %c0_27 = arith.constant 0 : index
    %84 = vector.load %arg3[%c13, %c0_27] : memref<16x128xf32, #tpu.memory_space<vmem>>, vector<1x128xf32>
    tpu.vector_store %arg3[%c13, %c0_27], %83 {strides = array<i32>} : memref<16x128xf32, #tpu.memory_space<vmem>>, vector<1x128xf32>,
    %c14_i32 = arith.constant 14 : i32
    %85 = arith.addi %0, %c14_i32 : i32
    %86 = arith.index_cast %85 : i32 to index
    %87 = memref.load %arg1[%86] : memref<16xi32, #tpu.memory_space<smem>>
    %88 = arith.index_cast %87 : i32 to index
    %c0_28 = arith.constant 0 : index
    %89 = vector.load %arg2[%88, %c0_28] : memref<64x128xf32, #tpu.memory_space<vmem>>, vector<1x128xf32>
    %c14 = arith.constant 14 : index
    %c0_29 = arith.constant 0 : index
    %90 = vector.load %arg3[%c14, %c0_29] : memref<16x128xf32, #tpu.memory_space<vmem>>, vector<1x128xf32>
    tpu.vector_store %arg3[%c14, %c0_29], %89 {strides = array<i32>} : memref<16x128xf32, #tpu.memory_space<vmem>>, vector<1x128xf32>,
    %c15_i32 = arith.constant 15 : i32
    %91 = arith.addi %0, %c15_i32 : i32
    %92 = arith.index_cast %91 : i32 to index
    %93 = memref.load %arg1[%92] : memref<16xi32, #tpu.memory_space<smem>>
    %94 = arith.index_cast %93 : i32 to index
    %c0_30 = arith.constant 0 : index
    %95 = vector.load %arg2[%94, %c0_30] : memref<64x128xf32, #tpu.memory_space<vmem>>, vector<1x128xf32>
    %c15 = arith.constant 15 : index
    %c0_31 = arith.constant 0 : index
    %96 = vector.load %arg3[%c15, %c0_31] : memref<16x128xf32, #tpu.memory_space<vmem>>, vector<1x128xf32>
    tpu.vector_store %arg3[%c15, %c0_31], %95 {strides = array<i32>} : memref<16x128xf32, #tpu.memory_space<vmem>>, vector<1x128xf32>,
    return
  }
  func.func @transform_0(%arg0: i32, %arg1: memref<16xi32, #tpu.memory_space<smem>>) -> (i32, i32) {
    %c0_i32 = arith.constant 0 : i32
    %c0_i32_0 = arith.constant 0 : i32
    %c0_i32_1 = arith.constant 0 : i32
    return %c0_i32, %c0_i32_0 : i32, i32
  }
  func.func @transform_1(%arg0: i32, %arg1: memref<16xi32, #tpu.memory_space<smem>>) -> (i32, i32) {
    %c0_i32 = arith.constant 0 : i32
    %c0_i32_0 = arith.constant 0 : i32
    return %arg0, %c0_i32 : i32, i32
  }
}

</mosaic_0001>

<bundles_post_ra>
// kernel: tpu_custom_call.1
= control target key start
LH: loop header
LB: loop body
LE: loop exit
PB: predicated region body
PF: predicated region fallthrough
CT: control target
= control target key end

     0   :  { %s215_s9 = smov [#allocation3]   ;;  %s250_s0 = inlined_call_operand.hbm [shape: s32[16], index: 0, kind: input, shape index: {}]   ;;  %s251_s1 = inlined_call_operand.hbm [shape: f32[64,128], index: 1, kind: input, shape index: {}]   ;;  %s252_s2 = inlined_call_operand.hbm [shape: f32[16,128], index: 2, kind: output, shape index: {}]  }
   0x1   :  { %8 = dma.hbm_to_smem %s250_s0, 16, %s215_s9, [#allocation2] }
   0x2   :  { %209 = dma.done.wait [#allocation2], 16 }
   0x3   :  { %210 = vsyncadd [#allocation2], 4294967280 }
   0x4   :  { %10 = sfence }
   0x5   :  { %11 = vsyncpa [#allocation5], 0 }
   0x6   :  { %12 = vsyncpa [#allocation6], 0  ;;  %s216_s12 = smov [#allocation4]  }
   0x7   :  { %s18_s13 = sshll.u32 %s216_s12, 4  ;;  %s19_s13 = int_to_ptr.vmem [resolvable:$true] %s18_s13 }
   0x8   :  { %s177_s14 = scalar_lea.vmem %s19_s13, 1024  ;;  %p182_p1 = scmp.lt.s32.totalorder %s19_s13, %s19_s13 }
   0x9   :  { %p178_p0 = scmp.ne.s32.totalorder %s19_s13, %s177_s14  ;;  %p183_p2 = scmp.lt.s32.totalorder %s177_s14, %s177_s14 }
   0xb   :  { %p184_p3 = por %p183_p2, %p182_p1 }
   0xd   :  { %p185_p4 = pnand %p184_p3, %p178_p0 }
   0xf   :  { %188 = shalt.err (!%p185_p4)
}
  0x10   :  { %s217_s15 = smov 128   ;;  %s218_s16 = smov 8  }
  0x11   :  { %24 = dma.hbm_to_vmem [thread:$0]  %s251_s1, 1024, %s19_s13, [#allocation5], %s217_s15, %s217_s15, %s218_s16  }
  0x12   :  { %211 = dma.done.wait [#allocation5], 1024  }
  0x13   :  { %212 = vsyncadd [#allocation5], 4294966272  ;;  %s29_s18 = sld [smem:[#allocation3]] }
  0x14   :  { %s141_s19 = sld [smem:[#allocation3 + $0x1]] }
  0x15   :  { %s142_s20 = sld [smem:[#allocation3 + $0x2]] }
  0x16   :  { %s143_s21 = sld [smem:[#allocation3 + $0x3]] }
  0x17   :  { %s144_s22 = sld [smem:[#allocation3 + $0x4]] }
  0x18   :  { %s145_s23 = sld [smem:[#allocation3 + $0x5]] }
  0x19   :  { %s146_s24 = sld [smem:[#allocation3 + $0x6]]  ;;  %s30_s25 = scalar_lea.vmem [#allocation4], %s29_s18 }
  0x1a   :  { %v31_v0 = vld [vmem:[%s30_s25] sm:$0x1]  ;;  %s147_s26 = sld [smem:[#allocation3 + $0x7]]  ;;  %s35_s27 = scalar_lea.vmem [#allocation4], %s141_s19 }
  0x1b   :  { %32 = vst [vmem:[#allocation7] sm:$0x1] %v31_v0  ;;  %v36_v1 = vld [vmem:[%s35_s27] sm:$0x1]  ;;  %s148_s28 = sld [smem:[#allocation3 + $0x8]]  ;;  %s40_s29 = scalar_lea.vmem [#allocation4], %s142_s20 }
  0x1c   :  { %37 = vst [vmem:[#allocation7 + $0x1] sm:$0x1] %v36_v1  ;;  %v41_v2 = vld [vmem:[%s40_s29] sm:$0x1]  ;;  %s149_s1 = sld [smem:[#allocation3 + $0x9]]  ;;  %s45_s30 = scalar_lea.vmem [#allocation4], %s143_s21 }
  0x1d   :  { %42 = vst [vmem:[#allocation7 + $0x2] sm:$0x1] %v41_v2  ;;  %v46_v3 = vld [vmem:[%s45_s30] sm:$0x1]  ;;  %s150_s3 = sld [smem:[#allocation3 + $0xa]]  ;;  %s50_s4 = scalar_lea.vmem [#allocation4], %s144_s22 }
  0x1e   :  { %47 = vst [vmem:[#allocation7 + $0x3] sm:$0x1] %v46_v3  ;;  %v51_v4 = vld [vmem:[%s50_s4] sm:$0x1]  ;;  %s151_s5 = sld [smem:[#allocation3 + $0xb]]  ;;  %s55_s6 = scalar_lea.vmem [#allocation4], %s145_s23 }
  0x1f   :  { %52 = vst [vmem:[#allocation7 + $0x4] sm:$0x1] %v51_v4  ;;  %v56_v5 = vld [vmem:[%s55_s6] sm:$0x1]  ;;  %s152_s7 = sld [smem:[#allocation3 + $0xc]]  ;;  %s60_s8 = scalar_lea.vmem [#allocation4], %s146_s24 }
  0x20   :  { %57 = vst [vmem:[#allocation7 + $0x5] sm:$0x1] %v56_v5  ;;  %v61_v6 = vld [vmem:[%s60_s8] sm:$0x1]  ;;  %s153_s9 = sld [smem:[#allocation3 + $0xd]]  ;;  %s65_s10 = scalar_lea.vmem [#allocation4], %s147_s26 }
  0x21   :  { %62 = vst [vmem:[#allocation7 + $0x6] sm:$0x1] %v61_v6  ;;  %v66_v7 = vld [vmem:[%s65_s10] sm:$0x1]  ;;  %s154_s11 = sld [smem:[#allocation3 + $0xe]]  ;;  %s70_s12 = scalar_lea.vmem [#allocation4], %s148_s28 }
  0x22   :  { %67 = vst [vmem:[#allocation7 + $0x7] sm:$0x1] %v66_v7  ;;  %v71_v8 = vld [vmem:[%s70_s12] sm:$0x1]  ;;  %s155_s13 = sld [smem:[#allocation3 + $0xf]]  ;;  %s75_s14 = scalar_lea.vmem [#allocation4], %s149_s1 }
  0x23   :  { %72 = vst [vmem:[#allocation7 + $0x8] sm:$0x1] %v71_v8  ;;  %v76_v9 = vld [vmem:[%s75_s14] sm:$0x1]  ;;  %s80_s0 = scalar_lea.vmem [#allocation4], %s150_s3  ;;  %s219_s18 = smov [#allocation7]  }
  0x24   :  { %77 = vst [vmem:[#allocation7 + $0x9] sm:$0x1] %v76_v9  ;;  %v81_v10 = vld [vmem:[%s80_s0] sm:$0x1]  ;;  %s85_s17 = scalar_lea.vmem [#allocation4], %s151_s5  ;;  %s113_s19 = sshll.u32 %s219_s18, 4  ;;  %s114_s19 = int_to_ptr.vmem [resolvable:$true] %s113_s19 }
  0x25   :  { %82 = vst [vmem:[#allocation7 + $0xa] sm:$0x1] %v81_v10  ;;  %v86_v11 = vld [vmem:[%s85_s17] sm:$0x1]  ;;  %s90_s20 = scalar_lea.vmem [#allocation4], %s152_s7  ;;  %s189_s24 = scalar_lea.vmem %s114_s19, 256 }
  0x26   :  { %87 = vst [vmem:[#allocation7 + $0xb] sm:$0x1] %v86_v11  ;;  %v91_v12 = vld [vmem:[%s90_s20] sm:$0x1]  ;;  %s95_s21 = scalar_lea.vmem [#allocation4], %s153_s9  ;;  %p190_p5 = scmp.ne.s32.totalorder %s114_s19, %s189_s24 }
  0x27   :  { %92 = vst [vmem:[#allocation7 + $0xc] sm:$0x1] %v91_v12  ;;  %v96_v13 = vld [vmem:[%s95_s21] sm:$0x1]  ;;  %s100_s22 = scalar_lea.vmem [#allocation4], %s154_s11  ;;  %p194_p6 = scmp.lt.s32.totalorder %s114_s19, %s114_s19 }
  0x28   :  { %97 = vst [vmem:[#allocation7 + $0xd] sm:$0x1] %v96_v13  ;;  %v101_v14 = vld [vmem:[%s100_s22] sm:$0x1]  ;;  %s105_s23 = scalar_lea.vmem [#allocation4], %s155_s13  ;;  %p195_p7 = scmp.lt.s32.totalorder %s189_s24, %s189_s24 }
  0x29   :  { %102 = vst [vmem:[#allocation7 + $0xe] sm:$0x1] %v101_v14  ;;  %v106_v15 = vld [vmem:[%s105_s23] sm:$0x1] }
  0x2a   :  { %107 = vst [vmem:[#allocation7 + $0xf] sm:$0x1] %v106_v15  ;;  %p196_p8 = por %p195_p7, %p194_p6 }
  0x2c   :  { %p197_p9 = pnand %p196_p8, %p190_p5 }
  0x2e   :  { %200 = shalt.err (!%p197_p9)
}
  0x2f   :  { %119 = dma.vmem_to_hbm [thread:$0]  %s114_s19, 256, %s252_s2, [#allocation6], %s217_s15, %s217_s15, %s218_s16  }
  0x30   :  { %213 = dma.done.wait [#allocation6], 256  }
  0x31   :  { %214 = vsyncadd [#allocation6], 4294967040 }
  0x32   :  { %123 = vsyncpa [#allocation5], 1 }
  0x33   :  { %124 = vsyncpa [#allocation6], 1 }

</bundles_post_ra>
